<compile_context>
chip_gen: v7x
topology: tpu7x:2x2x1
jax: 0.10.0
libtpu: 0.0.40
codegen_flags: <defaults>
</compile_context>

<pallas_src>
import functools

import jax
import jax.numpy as jnp
from jax.experimental import pallas as pl
from jax.experimental.pallas import tpu as pltpu


def _shortcut_kernel(x_ref, sel_ref, o_ref, *, pad, c):
    # x_ref:   (1, C, H*W)          one input image, spatial dims flattened
    # sel_ref: (H*W, Ho*Wo)         0/1 selection matrix implementing [::2, ::2]
    # o_ref:   (1, C + 2*pad, Ho*Wo)
    o_ref[...] = jnp.zeros_like(o_ref)                      # channel pad = 0
    down = jnp.dot(x_ref[0], sel_ref[...],
                   preferred_element_type=jnp.float32)      # (C, Ho*Wo)
    o_ref[0, pad:pad + c, :] = down.astype(o_ref.dtype)     # sliced store


def lambda_shortcut(x_nchw, planes):
    """Pallas version of:
       lambda x: F.pad(x[:, :, ::2, ::2], (0,0,0,0, planes//4, planes//4), 'constant', 0)
    Input/output are NCHW (PyTorch convention)."""
    n, c, h, w = x_nchw.shape
    pad = planes // 4
    h_out = (h + 1) // 2
    w_out = (w + 1) // 2
    c_out = c + 2 * pad
    hw, hw_out = h * w, h_out * w_out

    # Free reshape (row-major contiguous): fold spatial dims onto the lane axis.
    x_flat = x_nchw.reshape(n, c, hw)

    # 0/1 selection matrix: column (ho*Wo + wo) picks input element (2*ho, 2*wo).
    src = (2 * jnp.arange(h_out)[:, None] * w
           + 2 * jnp.arange(w_out)[None, :]).reshape(-1)            # (hw_out,)
    sel = (jnp.arange(hw)[:, None] == src[None, :]).astype(x_nchw.dtype)

    kernel = functools.partial(_shortcut_kernel, pad=pad, c=c)

    out = pl.pallas_call(
        kernel,
        out_shape=jax.ShapeDtypeStruct((n, c_out, hw_out), x_nchw.dtype),
        grid=(n,),
        in_specs=[
            pl.BlockSpec((1, c, hw), lambda i: (i, 0, 0)),
            # Same block every step -> stays resident in VMEM, no re-fetch.
            pl.BlockSpec((hw, hw_out), lambda i: (0, 0)),
        ],
        out_specs=pl.BlockSpec((1, c_out, hw_out), lambda i: (i, 0, 0)),
        compiler_params=pltpu.CompilerParams(
            dimension_semantics=("parallel",)),
    )(x_flat, sel)

    # Free reshape back to NCHW.
    return out.reshape(n, c_out, h_out, w_out)


if __name__ == "__main__":
    key = jax.random.PRNGKey(0)
    N, C, H, W = 2, 4, 16, 16
    planes = 8  # next block's width; channel pad = planes // 4 = 2 per side

    x = jax.random.normal(key, (N, C, H, W), dtype=jnp.float32)

    out = jax.block_until_ready(lambda_shortcut(x, planes))

    # pure-JAX reference of the PyTorch lambda
    pad = planes // 4
    ref = jnp.pad(x[:, :, ::2, ::2], ((0, 0), (pad, pad), (0, 0), (0, 0)))

    assert out.shape == ref.shape, (out.shape, ref.shape)
    assert out.dtype == ref.dtype
    assert jnp.allclose(out, ref), "mismatch vs reference"
    print("KERNEL_OK")
</pallas_src>

<mosaic_0001>
module attributes {stable_mosaic.version = 11 : i64} {
  func.func @_shortcut_kernel(%arg0: i32, %arg1: memref<1x4x256xf32, #tpu.memory_space<vmem>>, %arg2: memref<256x64xf32, #tpu.memory_space<vmem>>, %arg3: memref<1x8x64xf32, #tpu.memory_space<vmem>>) attributes {dimension_semantics = [#tpu.dimension_semantics<parallel>], iteration_bounds = array<i64: 2>, scalar_prefetch = 0 : i64, scratch_operands = 0 : i64, tpu.core_type = #tpu.core_type<tc>, window_params = [{transform_indices = @transform_0, window_bounds = array<i64: 1, 4, 256>}, {pipeline_mode = #tpu.pipeline_mode<synchronous>, transform_indices = @transform_1, window_bounds = array<i64: 256, 64>}, {transform_indices = @transform_2, window_bounds = array<i64: 1, 8, 64>}]} {
    %cst = arith.constant 0.000000e+00 : f32
    %0 = vector.broadcast %cst : f32 to vector<1x8x64xf32>
    %c0 = arith.constant 0 : index
    %c0_0 = arith.constant 0 : index
    %c0_1 = arith.constant 0 : index
    %1 = vector.load %arg3[%c0, %c0_0, %c0_1] : memref<1x8x64xf32, #tpu.memory_space<vmem>>, vector<1x8x64xf32>
    tpu.vector_store %arg3[%c0, %c0_0, %c0_1], %0 {strides = array<i32>} : memref<1x8x64xf32, #tpu.memory_space<vmem>>, vector<1x8x64xf32>,
    %c0_2 = arith.constant 0 : index
    %c0_3 = arith.constant 0 : index
    %c0_4 = arith.constant 0 : index
    %2 = vector.load %arg1[%c0_2, %c0_3, %c0_4] : memref<1x4x256xf32, #tpu.memory_space<vmem>>, vector<1x4x256xf32>
    %3 = vector.shape_cast %2 : vector<1x4x256xf32> to vector<4x256xf32>
    %c0_5 = arith.constant 0 : index
    %c0_6 = arith.constant 0 : index
    %4 = vector.load %arg2[%c0_5, %c0_6] : memref<256x64xf32, #tpu.memory_space<vmem>>, vector<256x64xf32>
    %cst_7 = arith.constant dense<0.000000e+00> : vector<4x64xf32>
    %5 = tpu.matmul %3, %4, %cst_7 {dimension_numbers = #tpu.dot_dimension_numbers<[1], [0], [0], [1], [0, 0, 1, 1], [], []>} : vector<4x256xf32>, vector<256x64xf32>, vector<4x64xf32> -> vector<4x64xf32>
    %c0_8 = arith.constant 0 : index
    %c2 = arith.constant 2 : index
    %c0_9 = arith.constant 0 : index
    %6 = vector.load %arg3[%c0_8, %c2, %c0_9] : memref<1x8x64xf32, #tpu.memory_space<vmem>>, vector<1x4x64xf32>
    %7 = vector.shape_cast %6 : vector<1x4x64xf32> to vector<4x64xf32>
    %8 = vector.shape_cast %5 : vector<4x64xf32> to vector<1x4x64xf32>
    tpu.vector_store %arg3[%c0_8, %c2, %c0_9], %8 {strides = array<i32>} : memref<1x8x64xf32, #tpu.memory_space<vmem>>, vector<1x4x64xf32>,
    return
  }
  func.func @transform_0(%arg0: i32) -> (i32, i32, i32) {
    %c0_i32 = arith.constant 0 : i32
    %c0_i32_0 = arith.constant 0 : i32
    %c0_i32_1 = arith.constant 0 : i32
    return %arg0, %c0_i32, %c0_i32_0 : i32, i32, i32
  }
  func.func @transform_1(%arg0: i32) -> (i32, i32) {
    %c0_i32 = arith.constant 0 : i32
    %c0_i32_0 = arith.constant 0 : i32
    %c0_i32_1 = arith.constant 0 : i32
    return %c0_i32, %c0_i32_0 : i32, i32
  }
  func.func @transform_2(%arg0: i32) -> (i32, i32, i32) {
    %c0_i32 = arith.constant 0 : i32
    %c0_i32_0 = arith.constant 0 : i32
    %c0_i32_1 = arith.constant 0 : i32
    return %arg0, %c0_i32, %c0_i32_0 : i32, i32, i32
  }
}

</mosaic_0001>

<bundles_post_ra>
// kernel: tpu_custom_call.1
= control target key start
LH: loop header
LB: loop body
LE: loop exit
PB: predicated region body
PF: predicated region fallthrough
CT: control target
= control target key end

     0   :  { %7 = vsyncpa [#allocation3], 0  ;;  %s722_s0 = inlined_call_operand.vmem [shape: f32[2,4,256], index: 0, kind: input, shape index: {}]   ;;  %s723_s1 = inlined_call_operand.vmem [shape: f32[256,64], index: 1, kind: input, shape index: {}]   ;;  %s724_s2 = inlined_call_operand.hbm [shape: f32[2,8,64], index: 2, kind: output, shape index: {}]  }
   0x1   :  { %9 = vsyncpa [#allocation3 + $0x1], 0  ;;  %s526_s9 = smov 0   ;;  %s528_s10 = smov 0  }
   0x2   :  { %s530_s11 = smov 0   ;;  %s532_s12 = smov 0  }
   0x3 LB: > { %s547_s13 = sadd.s32 4294967295, %s507_s12   ;;  %s325_s14 = sadd.s32 4294967294, %s507_s12   ;;  %s507_s12 = sphi %s532_s12, %s730_s12   ;;  %s503_s11 = sphi %s530_s11, %s729_s11   ;;  %s499_s10 = sphi %s528_s10, %s728_s10   ;;  %s495_s9 = sphi %s526_s9, %s727_s9  }
   0x4   : > { %s551_s15 = sadd.s32 1, %s507_s12   ;;  %s69_s16 = sadd.s32 1, %s503_s11 }
   0x5   : > { %s66_s17 = ssub.s32 %s507_s12, %s551_s15  ;;  %p79_p0 = scmp.ne.s32.totalorder %s503_s11, %s499_s10 }
   0x6   : > { %p67_p1 = scmp.eq.s32.totalorder %s66_s17, 0  ;;  %p80_p2 = scmp.eq.s32.totalorder %s547_s13, 1 }
   0x7   : > { %p85_p3 = scmp.ne.s32.totalorder %s499_s10, %s495_s9  ;;  %p86_p4 = scmp.eq.s32.totalorder %s325_s14, 1 }
   0x8   : > { %s562_s18 = scalar_select %p67_p1, %s503_s11, %s69_s16  }
   0x9   : > { %p564_p5 = por %p80_p2, %p79_p0  ;;  %p568_p6 = por %p86_p4, %p85_p3 }
   0xa   : > { %p328_p7 = scmp.ge.s32.totalorder %s507_s12, 1  ;;  %p115_p8 = scmp.lt.s32.totalorder %s507_s12, 3 }
   0xc   : > { %p116_p9 = pnand %p328_p7, %p115_p8 }
   0xd   : > { %v161_v0 = vld [vmem:[%s723_s1 + $0x80] sm:$0xff] (!%p116_p9)  ;;  %v162_v1 = vld [vmem:[%s723_s1 + $0x88] sm:$0xff] (!%p116_p9)  ;;  %p137_p10 = scmp.lt.s32.totalorder (!%p116_p9), %s547_s13, 1  ;;  %v163_v5 = vld [vmem:[%s723_s1 + $0x90] sm:$0xff] (!%p116_p9)  ;;  %s134_s5 = sand.u32 (!%p116_p9), 1, %s499_s10   ;;  %vm142_vm0 = vcmask (!%p116_p9), 523264  }
   0xe   : > { %119 = sbr.rel (%p116_p9) target bundleno = 277 (0x115), region = 28  ;;  %v145_v2 = vld [vmem:[%s723_s1] sm:$0xff] (!%p116_p9)  ;;  %v372_v3 = vpack.c.bf16 (!%p116_p9), %v162_v1, %v161_v0  ;;  %v146_v4 = vld [vmem:[%s723_s1 + $0x8] sm:$0xff] (!%p116_p9)  ;;  %v164_v6 = vld [vmem:[%s723_s1 + $0x98] sm:$0xff] (!%p116_p9)  ;;  %v509_v50 = vmov (!%p116_p9), 0.0   ;;  %s333_s8 = sshll.u32 (!%p116_p9), %s547_s13, 7 }
   0xf   : > { %v374_v7 = vpack.c.bf16 (!%p116_p9), %v146_v4, %v145_v2  ;;  %v376_v8 = vpack.c.bf16 (!%p116_p9), %v164_v6, %v163_v5  ;;  %v147_v9 = vld [vmem:[%s723_s1 + $0x10] sm:$0xff] (!%p116_p9)  ;;  %v148_v10 = vld [vmem:[%s723_s1 + $0x18] sm:$0xff] (!%p116_p9)  ;;  %v165_v11 = vld [vmem:[%s723_s1 + $0xa0] sm:$0xff] (!%p116_p9)  ;;  %vm250_vm1 = vcmask (!%p116_p9), 519168   ;;  %s680_s21 = scalar_lea.hbm (!%p116_p9), %s724_s2, %s333_s8  ;;  %s253_s22 = scalar_lea.sflag (!%p116_p9), [#allocation3], %s134_s5 }
  0x10   : > { %373 = vmatprep.subr.bf16.mxu0 (!%p116_p9), %v372_v3  ;;  %v166_v12 = vld [vmem:[%s723_s1 + $0xa8] sm:$0xff] (!%p116_p9)  ;;  %v378_v13 = vpack.c.bf16 (!%p116_p9), %v148_v10, %v147_v9  ;;  %v149_v15 = vld [vmem:[%s723_s1 + $0x20] sm:$0xff] (!%p116_p9)  ;;  %v167_v17 = vld [vmem:[%s723_s1 + $0xb0] sm:$0xff] (!%p116_p9) }
  0x11   : > { %375 = vmatpush3.bf16.msra.mxu0 (!%p116_p9), %v374_v7  ;;  %v380_v14 = vpack.c.bf16 (!%p116_p9), %v166_v12, %v165_v11  ;;  %v150_v16 = vld [vmem:[%s723_s1 + $0x28] sm:$0xff] (!%p116_p9)  ;;  %v168_v18 = vld [vmem:[%s723_s1 + $0xb8] sm:$0xff] (!%p116_p9)  ;;  %v151_v21 = vld [vmem:[%s723_s1 + $0x30] sm:$0xff] (!%p116_p9) }
  0x12   : > { %377 = vmatprep.subr.bf16.mxu0 (!%p116_p9), %v376_v8  ;;  %v382_v19 = vpack.c.bf16 (!%p116_p9), %v150_v16, %v149_v15  ;;  %v384_v20 = vpack.c.bf16 (!%p116_p9), %v168_v18, %v167_v17  ;;  %v152_v22 = vld [vmem:[%s723_s1 + $0x38] sm:$0xff] (!%p116_p9)  ;;  %v169_v23 = vld [vmem:[%s723_s1 + $0xc0] sm:$0xff] (!%p116_p9)  ;;  %v170_v24 = vld [vmem:[%s723_s1 + $0xc8] sm:$0xff] (!%p116_p9) }
  0x13   : > { %v386_v27 = vpack.c.bf16 (!%p116_p9), %v152_v22, %v151_v21  ;;  %v388_v28 = vpack.c.bf16 (!%p116_p9), %v170_v24, %v169_v23  ;;  %v153_v29 = vld [vmem:[%s723_s1 + $0x40] sm:$0xff] (!%p116_p9)  ;;  %v154_v30 = vld [vmem:[%s723_s1 + $0x48] sm:$0xff] (!%p116_p9)  ;;  %v171_v31 = vld [vmem:[%s723_s1 + $0xd0] sm:$0xff] (!%p116_p9) }
  0x14   : > { %v172_v32 = vld [vmem:[%s723_s1 + $0xd8] sm:$0xff] (!%p116_p9)  ;;  %v390_v33 = vpack.c.bf16 (!%p116_p9), %v154_v30, %v153_v29  ;;  %v155_v35 = vld [vmem:[%s723_s1 + $0x50] sm:$0xff] (!%p116_p9)  ;;  %v173_v37 = vld [vmem:[%s723_s1 + $0xe0] sm:$0xff] (!%p116_p9) }
  0x15   : > { %s138_s17 = scalar_select %p137_p10, %s547_s13, 1  ;;  %379 = vmatpush3.bf16.msra.mxu0 %v378_v13  ;;  %v392_v34 = vpack.c.bf16 %v172_v32, %v171_v31  ;;  %v156_v36 = vld [vmem:[%s723_s1 + $0x58] sm:$0xff]  ;;  %v174_v38 = vld [vmem:[%s723_s1 + $0xe8] sm:$0xff]  ;;  %v157_v41 = vld [vmem:[%s723_s1 + $0x60] sm:$0xff] }
  0x16   : > { %381 = vmatprep.subr.bf16.mxu0 %v380_v14  ;;  %v394_v39 = vpack.c.bf16 %v156_v36, %v155_v35  ;;  %v396_v40 = vpack.c.bf16 %v174_v38, %v173_v37  ;;  %v158_v42 = vld [vmem:[%s723_s1 + $0x68] sm:$0xff]  ;;  %v175_v43 = vld [vmem:[%s723_s1 + $0xf0] sm:$0xff]  ;;  %v176_v44 = vld [vmem:[%s723_s1 + $0xf8] sm:$0xff]  ;;  %s510_s13 = smov [#allocation2]  }
  0x17   : > { %s336_s23 = sshll.u32 %s138_s17, 3  ;;  %v398_v45 = vpack.c.bf16 %v158_v42, %v157_v41  ;;  %v400_v46 = vpack.c.bf16 %v176_v44, %v175_v43  ;;  %v159_v47 = vld [vmem:[%s723_s1 + $0x70] sm:$0xff]  ;;  %v160_v48 = vld [vmem:[%s723_s1 + $0x78] sm:$0xff] }
  0x18   : > { %s141_s6 = scalar_lea.vmem %s722_s0, %s336_s23  ;;  %v402_v49 = vpack.c.bf16 %v160_v48, %v159_v47  ;;  %s449_s23 = sshll.u32 %s510_s13, 4  ;;  %s450_s23 = int_to_ptr.vmem [resolvable:$false] %s449_s23 }
  0x19   : > { %v144_v25 = vld [vmem:[%s141_s6] sm:$0xff]  ;;  %383 = vmatpush3.bf16.msra.mxu0 %v382_v19  ;;  %s329_s6 = sshll.u32 %s134_s5, 3  ;;  %s451_s25 = scalar_lea.vmem %s450_s23, 256 }
  0x1a   : > { %v178_v26 = vcombine.high %v144_v25, %v144_v25  ;;  %385 = vmatprep.subr.bf16.mxu0 %v384_v20  ;;  %s136_s7 = scalar_lea.vmem [#allocation2], %s329_s6 }
  0x1b   : > { %143 = vst.msk [vmem:[%s136_s7] sm:$0xff] %vm142_vm0, %v509_v50  ;;  %s266_s14 = sshll.u32 %s136_s7, 4  ;;  %s682_s14 = int_to_ptr.vmem [resolvable:$true] %s266_s14 }
  0x1c   : > { %244 = vmatprep.mubr.f32.mxu0 %v178_v26  ;;  %s445_s24 = scalar_lea.vmem %s682_s14, 128  ;;  %p452_p0 = scmp.lt.s32.totalorder %s682_s14, %s450_s23 }
  0x1d   : > { %387 = vmatpush3.bf16.msra.mxu0 %v386_v27  ;;  %p446_p11 = scmp.ne.s32.totalorder %s682_s14, %s445_s24  ;;  %p453_p1 = scmp.lt.s32.totalorder %s451_s25, %s445_s24 }
  0x1e   : > { %389 = vmatprep.subr.bf16.mxu0 %v388_v28 }
  0x1f   : > { %p447_p12 = pnand %p446_p11, %p564_p5  ;;  %p454_p2 = por %p453_p1, %p452_p0 }
  0x21   : > { %391 = vmatpush3.bf16.msra.mxu0 %v390_v33  ;;  %p448_p13 = pneg %p447_p12 }
  0x22   : > { %393 = vmatprep.subr.bf16.mxu0 %v392_v34 }
  0x23   : > { %p455_p3 = pnand %p454_p2, %p448_p13 }
  0x25   : > { %395 = vmatpush3.bf16.msra.mxu0 %v394_v39 }
  0x26   : > { %397 = vmatprep.subr.bf16.mxu0 %v396_v40 }
  0x29   : > { %399 = vmatpush3.bf16.msra.mxu0 %v398_v45 }
  0x2a   : > { %401 = vmatprep.subr.bf16.mxu0 %v400_v46 }
  0x2d   : > { %403 = vmatpush3.bf16.msra.mxu0 %v402_v49 }
  0x30   : > { %245 = vmatmul.mubr.f32.vlgmr.msra.gmra.mrb[0].mxu0 %v144_v25 }
 0x103   : > { %v369_v51 = vpop.f32.mrb[0].mxu0 }
 0x104   : > { %v370_v52 = vpop.f32.mrb[1].mxu0 }
 0x105   : > { %v371_v53 = vadd.f32 %v370_v52, %v369_v51 }
 0x107   : > { %251 = vst.msk [vmem:[%s136_s7 + $0x2] sm:$0xf] %vm250_vm1, %v371_v53 }
 0x108   : > { %458 = shalt.err (!%p455_p3)
}
 0x109   : > { %s459_s26 = scalar_lea.hbm %s680_s21, 128  ;;  %s463_s29 = scalar_lea.hbm %s724_s2, 256 }
 0x10a   : > { %p460_p4 = scmp.ne.s32.totalorder %s680_s21, %s459_s26  ;;  %p464_p9 = scmp.lt.u32.totalorder %s680_s21, %s724_s2 }
 0x10b   : > { %p465_p10 = scmp.lt.u32.totalorder %s463_s29, %s459_s26  ;;  %p467_p12 = scmp.lt.u32.totalorder %s459_s26, %s680_s21 }
 0x10c   : > { %p461_p7 = pnand %p460_p4, %p564_p5 }
 0x10d   : > { %p466_p11 = por %p465_p10, %p464_p9 }
 0x10e   : > { %p462_p8 = pneg %p461_p7 }
 0x10f   : > { %p468_p13 = por %p467_p12, %p466_p11 }
 0x111   : > { %p469_p0 = pnand %p468_p13, %p462_p8 }
 0x113   : > { %472 = shalt.err (!%p469_p0)
}
 0x114   : > { %404 = dma.vmem_to_hbm [thread:$0]  (%p564_p5), %s682_s14, 128, %s680_s21, %s253_s22  }
 0x115 PF: > { %p410_p1 = scmp.ge.s32.totalorder %s507_s12, 2  ;;  %s278_s4 = sand.u32 1, %s495_s9  }
 0x116   : > { %s279_s5 = scalar_lea.sflag [#allocation3], %s278_s4 }
 0x117   : > { %p407_p2 = pnand %p410_p1, %p568_p6 }
 0x119   : > { %490 = dma.done.wait (!%p407_p2), %s279_s5, 128  }
 0x11a   : > { %492 = vsyncadd (!%p407_p2), %s279_s5, 4294967168  ;;  %p12_p3 = scmp.ge.s32.totalorder %s551_s15, 4   ;;  %s727_s9 = smov %s499_s10 }
 0x11b   : > { %s728_s10 = smov %s503_s11  ;;  %s729_s11 = smov %s562_s18 }
 0x11c   : > { %s730_s12 = smov %s551_s15  ;;  %14 = sbr.rel (!%p12_p3) target bundleno = 3 (0x3), region = 63 }
 0x123   :  { %284 = vsyncpa [#allocation3], 1 }
 0x124   :  { %286 = vsyncpa [#allocation3 + $0x1], 1 }

</bundles_post_ra>
